<compile_context>
chip_gen: v5e
topology: v5e:2x2
jax: 0.10.0
libtpu: 0.0.40
codegen_flags: <defaults>
</compile_context>

<pallas_src>
import math

import jax
import jax.numpy as jnp
from jax.experimental import pallas as pl
from jax.experimental.pallas import tpu as pltpu


# Target for the double-buffered per-step working set (x blk + y blk + A chunk, x2).
# Kept well under v7x's 64 MiB physical VMEM (v5e/v6e have 128 MiB).
_VMEM_BLOCK_BUDGET = 16 * 1024 * 1024


def _round_up(a, b):
    return -(-a // b) * b


def _choose_tiling(T, V, W, C_in, C_out, itemsize, budget=_VMEM_BLOCK_BUDGET):
    """Pick (Tt, V_pad, W_pad, T_pad) such that Tt*V_pad and Tt*W_pad are multiples
    of 128 (lane-dense blocks) and the double-buffered block set fits `budget`."""

    def blk_bytes(tt, vp, wp):
        # x block + y block + block-diagonal A chunk, each double-buffered.
        return 2 * itemsize * (C_in * tt * vp + C_out * tt * wp + tt * vp * tt * wp)

    # Path 1: no padding -- some divisor of T already gives 128-aligned lane widths.
    for tt in range(T, 0, -1):
        if (T % tt == 0 and (tt * V) % 128 == 0 and (tt * W) % 128 == 0
                and blk_bytes(tt, V, W) <= budget):
            return tt, V, W, T

    # Path 2: pad the joint dims to multiples of 8 so a small base Tt (<=16) aligns
    # the lanes, and pad T up to a multiple of the chosen Tt.
    vp = _round_up(V, 8)
    wp = _round_up(W, 8)
    t_v = 128 // math.gcd(128, vp)
    t_w = 128 // math.gcd(128, wp)
    tt0 = t_v * t_w // math.gcd(t_v, t_w)              # lcm, <= 16
    cands = [tt0 * k for k in range(1, max(T // tt0, 1) + 1)
             if blk_bytes(tt0 * k, vp, wp) <= budget]
    if not cands:
        cands = [tt0]
    divs = [c for c in cands if T % c == 0]
    tt = max(divs) if divs else max(cands)
    return tt, vp, wp, _round_up(T, tt)


def _ctg_kernel(x_ref, w_ref, b_ref, a_ref, y_ref):
    # x_ref: (1, C_in, Tt*Vp)   one batch element, one chunk of Tt timesteps (lane-dense)
    # w_ref: (C_out, C_in)      resident 1x1-conv weight
    # b_ref: (C_out, 1)         resident conv bias (f32)
    # a_ref: (1, Tt*Vp, Tt*Wp)  block-diagonal adjacency chunk (resident across inner n axis)
    # y_ref: (1, C_out, Tt*Wp)  lane-dense output block (single dense store)
    z = jnp.dot(w_ref[...], x_ref[0], preferred_element_type=jnp.float32)
    z = z + b_ref[...]          # (C_out, 1) broadcast over lanes on the VPU -- nothing materialized
    y = jnp.dot(z, a_ref[0], preferred_element_type=jnp.float32)
    y_ref[0] = y.astype(y_ref.dtype)


def conv_temporal_graphical(x, A, weight, bias=None):
    """x: (N, C_in, T, V); A: (T, V, W); weight: (C_out, C_in) or (C_out, C_in, 1, 1);
    bias: (C_out,) or None.  Returns (y, A) with y: (N, C_out, T, W)."""
    N, C_in, T, V = x.shape
    Ta, Va, W = A.shape
    assert Ta == T and Va == V

    if weight.ndim == 4:
        # Conv2d weight (C_out, C_in, kt, kw); only the 1x1 pointwise case is supported.
        assert weight.shape[2:] == (1, 1), "temporal kernel_size > 1 not supported"
        weight = weight.reshape(weight.shape[0], weight.shape[1])
    C_out, C_in_w = weight.shape
    assert C_in_w == C_in

    itemsize = jnp.dtype(x.dtype).itemsize
    Tt, Vp, Wp, Tp = _choose_tiling(T, V, W, C_in, C_out, itemsize)
    TB = Tp // Tt

    # Pad only when the raw shapes are not 128-lane friendly (extra HBM pass).
    if (Tp, Vp) != (T, V):
        x = jnp.pad(x, ((0, 0), (0, 0), (0, Tp - T), (0, Vp - V)))
    if (Tp, Vp, Wp) != (T, V, W):
        A_p = jnp.pad(A, ((0, Tp - T), (0, Vp - V), (0, Wp - W)))
    else:
        A_p = A

    # Free trailing-dim merge: (N, C_in, Tp, Vp) -> (N, C_in, Tp*Vp).
    x_flat = x.reshape(N, C_in, Tp * Vp)

    # Block-diagonal adjacency chunks: A_bd[tb, tt*Vp+v, ss*Wp+w] = A[tb*Tt+tt, v, w] * (tt==ss).
    # Tiny (Tp*Tt*Vp*Wp elements); turns the per-timestep matmuls into one dense matmul.
    A_c = A_p.reshape(TB, Tt, Vp, Wp)
    eye = jnp.eye(Tt, dtype=A_p.dtype)
    A_bd = (A_c[:, :, :, None, :] * eye[None, :, None, :, None]).reshape(TB, Tt * Vp, Tt * Wp)

    if bias is None:
        b2d = jnp.zeros((C_out, 1), jnp.float32)
    else:
        b2d = bias.reshape(C_out, 1).astype(jnp.float32)

    # VMEM budget / scheduler hints.
    footprint = (2 * itemsize * (C_in * Tt * Vp + C_out * Tt * Wp + Tt * Vp * Tt * Wp)
                 + 4 * (C_out * C_in + C_out))
    vmem_limit = int(max(32 << 20, min(2 * footprint + (4 << 20), 48 << 20)))
    flops = 2 * N * Tp * Vp * C_out * C_in + 2 * N * Tp * Tt * Vp * C_out * Wp
    bytes_accessed = int(itemsize * (N * C_in * Tp * Vp + N * C_out * Tp * Wp)
                         + jnp.dtype(A.dtype).itemsize * (Tp * Tt * Vp * Wp)
                         + jnp.dtype(weight.dtype).itemsize * (C_out * C_in)
                         + 4 * C_out)

    y_flat = pl.pallas_call(
        _ctg_kernel,
        out_shape=jax.ShapeDtypeStruct((N, C_out, Tp * Wp), x.dtype),
        grid_spec=pltpu.PrefetchScalarGridSpec(
            num_scalar_prefetch=0,
            # tb outer / n inner: the A_bd chunk stays resident across all n
            # (no re-DMA), while x/y blocks change every step (they must anyway).
            grid=(TB, N),
            in_specs=[
                pl.BlockSpec((1, C_in, Tt * Vp), lambda tb, n: (n, 0, tb)),
                pl.BlockSpec((C_out, C_in), lambda tb, n: (0, 0)),
                pl.BlockSpec((C_out, 1), lambda tb, n: (0, 0)),
                pl.BlockSpec((1, Tt * Vp, Tt * Wp), lambda tb, n: (tb, 0, 0)),
            ],
            out_specs=pl.BlockSpec((1, C_out, Tt * Wp), lambda tb, n: (n, 0, tb)),
        ),
        compiler_params=pltpu.CompilerParams(
            dimension_semantics=("parallel", "parallel"),
            vmem_limit_bytes=vmem_limit),
        cost_estimate=pl.CostEstimate(flops=flops, transcendentals=0,
                                      bytes_accessed=bytes_accessed),
    )(x_flat, weight, b2d, A_bd)

    y = y_flat.reshape(N, C_out, Tp, Wp)       # free trailing-dim split
    if (Tp, Wp) != (T, W):
        y = y[:, :, :T, :W]                    # drop padding (only when padding was applied)
    return y, A


def _reference(x, A, weight, bias):
    # Pure-JAX reference of the PyTorch forward (1x1 conv + einsum).
    z = jnp.einsum('oc,nctv->notv', weight, x) + bias[None, :, None, None]
    return jnp.einsum('nctv,tvw->nctw', z, A)


if __name__ == "__main__":
    def run_case(N, C_in, C_out, T, V, W, key):
        kx, ka, kw, kb = jax.random.split(key, 4)
        x = jax.random.normal(kx, (N, C_in, T, V), dtype=jnp.float32)
        A = jax.random.normal(ka, (T, V, W), dtype=jnp.float32)
        weight = jax.random.normal(kw, (C_out, C_in), dtype=jnp.float32) * 0.1
        bias = jax.random.normal(kb, (C_out,), dtype=jnp.float32) * 0.1

        y, A_out = conv_temporal_graphical(x, A, weight, bias)
        y = jax.block_until_ready(y)

        y_ref = _reference(x, A, weight, bias)
        assert y.shape == (N, C_out, T, W)
        assert jnp.allclose(y, y_ref, atol=1e-4, rtol=1e-4), \
            float(jnp.max(jnp.abs(y - y_ref)))
        assert jnp.array_equal(A_out, A)

    key = jax.random.PRNGKey(0)
    k1, k2 = jax.random.split(key)
    # Lane-aligned path: Tt*V is a 128-multiple, no padding, single T-chunk, grid (1, N).
    run_case(N=2, C_in=4, C_out=8, T=8, V=16, W=16, key=k1)
    # General path: V/W not 128-friendly -> padded to (16, 16), T padded 12 -> 16, grid (2, N).
    run_case(N=2, C_in=4, C_out=8, T=12, V=10, W=12, key=k2)

    print("KERNEL_OK")
</pallas_src>

<mosaic_0001>
module attributes {stable_mosaic.version = 11 : i64} {
  func.func @_ctg_kernel(%arg0: i32, %arg1: i32, %arg2: memref<1x4x128xf32, #tpu.memory_space<vmem>>, %arg3: memref<8x4xf32, #tpu.memory_space<vmem>>, %arg4: memref<8x1xf32, #tpu.memory_space<vmem>>, %arg5: memref<1x128x128xf32, #tpu.memory_space<vmem>>, %arg6: memref<1x8x128xf32, #tpu.memory_space<vmem>>) attributes {dimension_semantics = [#tpu.dimension_semantics<parallel>, #tpu.dimension_semantics<parallel>], iteration_bounds = array<i64: 1, 2>, scalar_prefetch = 0 : i64, scratch_operands = 0 : i64, tpu.core_type = #tpu.core_type<tc>, window_params = [{transform_indices = @transform_0, window_bounds = array<i64: 1, 4, 128>}, {pipeline_mode = #tpu.pipeline_mode<synchronous>, transform_indices = @transform_1, window_bounds = array<i64: 8, 4>}, {pipeline_mode = #tpu.pipeline_mode<synchronous>, transform_indices = @transform_2, window_bounds = array<i64: 8, 1>}, {transform_indices = @transform_3, window_bounds = array<i64: 1, 128, 128>}, {transform_indices = @transform_4, window_bounds = array<i64: 1, 8, 128>}]} {
    %c0 = arith.constant 0 : index
    %c0_0 = arith.constant 0 : index
    %0 = vector.load %arg3[%c0, %c0_0] : memref<8x4xf32, #tpu.memory_space<vmem>>, vector<8x4xf32>
    %c0_1 = arith.constant 0 : index
    %c0_2 = arith.constant 0 : index
    %c0_3 = arith.constant 0 : index
    %1 = vector.load %arg2[%c0_1, %c0_2, %c0_3] : memref<1x4x128xf32, #tpu.memory_space<vmem>>, vector<1x4x128xf32>
    %2 = vector.shape_cast %1 : vector<1x4x128xf32> to vector<4x128xf32>
    %cst = arith.constant dense<0.000000e+00> : vector<8x128xf32>
    %3 = tpu.matmul %0, %2, %cst {dimension_numbers = #tpu.dot_dimension_numbers<[1], [0], [0], [1], [0, 0, 1, 1], [], []>} : vector<8x4xf32>, vector<4x128xf32>, vector<8x128xf32> -> vector<8x128xf32>
    %c0_4 = arith.constant 0 : index
    %c0_5 = arith.constant 0 : index
    %4 = vector.load %arg4[%c0_4, %c0_5] : memref<8x1xf32, #tpu.memory_space<vmem>>, vector<8x1xf32>
    %5 = vector.broadcast %4 : vector<8x1xf32> to vector<8x128xf32>
    %6 = arith.addf %3, %5 : vector<8x128xf32>
    %c0_6 = arith.constant 0 : index
    %c0_7 = arith.constant 0 : index
    %c0_8 = arith.constant 0 : index
    %7 = vector.load %arg5[%c0_6, %c0_7, %c0_8] : memref<1x128x128xf32, #tpu.memory_space<vmem>>, vector<1x128x128xf32>
    %8 = vector.shape_cast %7 : vector<1x128x128xf32> to vector<128x128xf32>
    %cst_9 = arith.constant dense<0.000000e+00> : vector<8x128xf32>
    %9 = tpu.matmul %6, %8, %cst_9 {dimension_numbers = #tpu.dot_dimension_numbers<[1], [0], [0], [1], [0, 0, 1, 1], [], []>} : vector<8x128xf32>, vector<128x128xf32>, vector<8x128xf32> -> vector<8x128xf32>
    %c0_10 = arith.constant 0 : index
    %c0_11 = arith.constant 0 : index
    %c0_12 = arith.constant 0 : index
    %10 = vector.load %arg6[%c0_10, %c0_11, %c0_12] : memref<1x8x128xf32, #tpu.memory_space<vmem>>, vector<1x8x128xf32>
    %11 = vector.shape_cast %10 : vector<1x8x128xf32> to vector<8x128xf32>
    %12 = vector.shape_cast %9 : vector<8x128xf32> to vector<1x8x128xf32>
    tpu.vector_store %arg6[%c0_10, %c0_11, %c0_12], %12 {strides = array<i32>} : memref<1x8x128xf32, #tpu.memory_space<vmem>>, vector<1x8x128xf32>,
    return
  }
  func.func @transform_0(%arg0: i32, %arg1: i32) -> (i32, i32, i32) {
    %c0_i32 = arith.constant 0 : i32
    %c0_i32_0 = arith.constant 0 : i32
    return %arg1, %c0_i32, %arg0 : i32, i32, i32
  }
  func.func @transform_1(%arg0: i32, %arg1: i32) -> (i32, i32) {
    %c0_i32 = arith.constant 0 : i32
    %c0_i32_0 = arith.constant 0 : i32
    %c0_i32_1 = arith.constant 0 : i32
    return %c0_i32, %c0_i32_0 : i32, i32
  }
  func.func @transform_2(%arg0: i32, %arg1: i32) -> (i32, i32) {
    %c0_i32 = arith.constant 0 : i32
    %c0_i32_0 = arith.constant 0 : i32
    %c0_i32_1 = arith.constant 0 : i32
    return %c0_i32, %c0_i32_0 : i32, i32
  }
  func.func @transform_3(%arg0: i32, %arg1: i32) -> (i32, i32, i32) {
    %c0_i32 = arith.constant 0 : i32
    %c0_i32_0 = arith.constant 0 : i32
    %c0_i32_1 = arith.constant 0 : i32
    return %arg0, %c0_i32, %c0_i32_0 : i32, i32, i32
  }
  func.func @transform_4(%arg0: i32, %arg1: i32) -> (i32, i32, i32) {
    %c0_i32 = arith.constant 0 : i32
    %c0_i32_0 = arith.constant 0 : i32
    return %arg1, %c0_i32, %arg0 : i32, i32, i32
  }
}

</mosaic_0001>

<bundles_post_ra>
// kernel: tpu_custom_call.1
= control target key start
LH: loop header
LB: loop body
LE: loop exit
PB: predicated region body
PF: predicated region fallthrough
CT: control target
= control target key end

     0   :  { %9 = vsyncpa [#allocation3], 0  ;;  %s752_s0 = inlined_call_operand.vmem [shape: f32[2,4,128], index: 0, kind: input, shape index: {}]   ;;  %s753_s1 = inlined_call_operand.vmem [shape: f32[8,4], index: 1, kind: input, shape index: {}]   ;;  %s754_s2 = inlined_call_operand.vmem [shape: f32[8,1], index: 2, kind: input, shape index: {}]   ;;  %s755_s3 = inlined_call_operand.hbm [shape: f32[1,128,128], index: 3, kind: input, shape index: {}]   ;;  %s756_s4 = inlined_call_operand.hbm [shape: f32[2,8,128], index: 4, kind: output, shape index: {}]  }
   0x1   :  { %10 = vsyncpa [#allocation4], 0 }
   0x2   :  { %12 = vsyncpa [#allocation4 + $0x1], 0  ;;  %s646_s15 = smov 0   ;;  %s648_s16 = smov 0  }
   0x3   :  { %s650_s17 = smov 0   ;;  %s652_s18 = smov 0  }
   0x4   :  { %s654_s19 = smov 0   ;;  %s656_s20 = smov 0  }
   0x5 LB: > { %s418_s21 = sadd.s32 4294967295, %s615_s20   ;;  %s419_s22 = sadd.s32 4294967294, %s615_s20   ;;  %s615_s20 = sphi %s656_s20, %s18_s20   ;;  %s611_s19 = sphi %s654_s19, %s763_s19   ;;  %s607_s18 = sphi %s652_s18, %s762_s18   ;;  %s603_s17 = sphi %s650_s17, %s761_s17   ;;  %s599_s16 = sphi %s648_s16, %s760_s16   ;;  %s595_s15 = sphi %s646_s15, %s759_s15  }
   0x6   : > { %s27_s23 = sadd.s32 1, %s611_s19  ;;  %s135_s24 = sadd.s32 1, %s603_s17 }
   0x7   : > { %p28_p0 = scmp.ge.s32.totalorder %s27_s23, 2  ;;  %p145_p1 = scmp.ne.s32.totalorder %s603_s17, %s599_s16 }
   0x8   : > { %p146_p2 = scmp.eq.s32.totalorder %s418_s21, 1  ;;  %p151_p3 = scmp.ne.s32.totalorder %s599_s16, %s595_s15 }
   0x9   : > { %s765_s23 = smov (%p28_p0, %s27_s23), 0  ;;  %p152_p5 = scmp.eq.s32.totalorder %s419_s22, 1 }
   0xa   : > { %p686_p4 = por %p146_p2, %p145_p1  ;;  %s130_s26 = ssub.s32 %s611_s19, %s765_s23 }
   0xb   : > { %p420_p6 = scmp.ge.s32.totalorder %s615_s20, 1  ;;  %p133_p7 = scmp.eq.s32.totalorder %s130_s26, 0 }
   0xc   : > { %p693_p8 = por %p152_p5, %p151_p3  ;;  %p159_p9 = scmp.lt.s32.totalorder %s615_s20, 3 }
   0xd   : > { %s699_s28 = scalar_select %p133_p7, %s603_s17, %s135_s24  }
   0xe   : > { %p160_p10 = pnand %p420_p6, %p159_p9  ;;  %p447_p11 = scmp.eq.s32.totalorder %s418_s21, 0 }
   0xf   : > { %s179_s5 = sshll.u32 %s755_s3, 4  ;;  %s617_s6 = smov [#allocation2]   ;;  %s180_s5 = int_to_ptr.hbm [resolvable:$true] %s179_s5 }
  0x10   : > { %p439_p12 = pneg %p160_p10  ;;  %s181_s7 = sshll.u32 %s617_s6, 4  ;;  %s182_s7 = int_to_ptr.vmem [resolvable:$true] %s181_s7 }
  0x11   : > { %s618_s8 = smov 128   ;;  %s619_s9 = smov 8  }
  0x12   : > { %p440_p13 = pnand %p447_p11, %p439_p12  ;;  %207 = sbr.rel (%p160_p10) target bundleno = 289 (0x121), region = 36 }
  0x14   : > { %442 = dma.hbm_to_vmem [thread:$0]  (!%p440_p13), %s180_s5, 2048, %s182_s7, [#allocation3], %s618_s8, %s618_s8, %s619_s9  }
  0x17   : > { %586 = dma.done.wait (%p447_p11), [#allocation3], 2048  }
  0x18   : > { %588 = vsyncadd (%p447_p11), [#allocation3], 4294965248  ;;  %p236_p0 = scmp.lt.s32.totalorder %s607_s18, 1  ;;  %v620_v0 = vmov 0   ;;  %vm255_vm0 = vcmask 1043456   ;;  %vm251_vm1 = vcmask 31744  }
  0x19   : > { %502 = vset.pattern.permute.xlu0 %v620_v0  ;;  %v243_v2 = vld [vmem:[%s753_s1] sm:$0xff]  ;;  %v294_v4 = vld [vmem:[#allocation2 + $0x78] sm:$0xff]  ;;  %v293_v5 = vld [vmem:[#allocation2 + $0x70] sm:$0xff]  ;;  %s233_s29 = sand.u32 1, %s599_s16   ;;  %s430_s5 = sshll.u32 %s607_s18, 3 }
  0x1a   : > { %s237_s10 = scalar_select %p236_p0, %s607_s18, 1  ;;  %v245_v3 = vld [vmem:[%s754_s2] sm:$0xff]  ;;  %295 = vmatpush.msra.mxu1 %v294_v4  ;;  %v292_v6 = vld [vmem:[#allocation2 + $0x68] sm:$0xff]  ;;  %v290_v8 = vld [vmem:[#allocation2 + $0x58] sm:$0xff] }
  0x1b   : > { %248 = vperm.xlu0 %502, %v245_v3   ;;  %v291_v7 = vld [vmem:[#allocation2 + $0x60] sm:$0xff]  ;;  %v289_v9 = vld [vmem:[#allocation2 + $0x50] sm:$0xff]  ;;  %v288_v10 = vld [vmem:[#allocation2 + $0x48] sm:$0xff]  ;;  %s425_s30 = sshll.u32 %s233_s29, 3  ;;  %s328_s8 = scalar_lea.hbm %s756_s4, %s430_s5 }
  0x1c   : > { %s426_s11 = sshll.u32 %s237_s10, 2  ;;  %296 = vmatpush.msra.mxu1 %v293_v5  ;;  %v287_v11 = vld [vmem:[#allocation2 + $0x40] sm:$0xff]  ;;  %v286_v12 = vld [vmem:[#allocation2 + $0x38] sm:$0xff]  ;;  %v285_v13 = vld [vmem:[#allocation2 + $0x30] sm:$0xff]  ;;  %s235_s9 = scalar_lea.vmem [#allocation5], %s425_s30 }
  0x1d   : > { %s242_s14 = scalar_lea.vmem %s752_s0, %s426_s11  ;;  %v284_v14 = vld [vmem:[#allocation2 + $0x28] sm:$0xff]  ;;  %v283_v15 = vld [vmem:[#allocation2 + $0x20] sm:$0xff]  ;;  %v282_v16 = vld [vmem:[#allocation2 + $0x18] sm:$0xff]  ;;  %s330_s10 = sshll.u32 %s235_s9, 4  ;;  %s331_s10 = int_to_ptr.vmem [resolvable:$true] %s330_s10 }
  0x1e   : > { %v244_v1 = vld [vmem:[%s242_s14] sm:$0xf]  ;;  %297 = vmatpush.msra.mxu1 %v292_v6  ;;  %v281_v17 = vld [vmem:[#allocation2 + $0x10] sm:$0xff]  ;;  %v280_v18 = vld [vmem:[#allocation2 + $0x8] sm:$0xff]  ;;  %s332_s11 = sshll.u32 %s328_s8, 4  ;;  %s317_s12 = scalar_lea.sflag [#allocation4], %s233_s29  ;;  %s333_s11 = int_to_ptr.hbm [resolvable:$true] %s332_s11 }
  0x1f   : > { %427 = vmatpush.msk.msra.mxu0 %vm255_vm0, %v244_v1  ;;  %v279_v19 = vld [vmem:[#allocation2] sm:$0xff]  ;;  %s547_s13 = sshra.s32 %s333_s11, 4  ;;  %s553_s22 = scalar_lea.hbm %s756_s4, 16  ;;  %s548_s13 = int_to_ptr.hbm [resolvable:$true] %s547_s13 }
  0x20   : > { %428 = vmatmul.msk.f32.vlgmr.msra.gmra.mxu0 %vm251_vm1, %v243_v2  ;;  %298 = vmatpush.msra.mxu1 %v291_v7  ;;  %s549_s14 = scalar_lea.hbm %s548_s13, 8  ;;  %p554_p5 = scmp.lt.s32.totalorder %s548_s13, %s756_s4 }
  0x21   : > { %p550_p1 = scmp.ne.s32.totalorder %s548_s13, %s549_s14  ;;  %p555_p6 = scmp.lt.s32.totalorder %s553_s22, %s549_s14 }
  0x22   : > { %299 = vmatpush.msra.mxu1 %v290_v8 }
  0x23   : > { %p551_p2 = pnand %p550_p1, %p686_p4  ;;  %p556_p7 = por %p555_p6, %p554_p5 }
  0x24   : > { %300 = vmatpush.msra.mxu1 %v289_v9 }
  0x25   : > { %p552_p3 = pneg %p551_p2 }
  0x26   : > { %301 = vmatpush.msra.mxu1 %v288_v10 }
  0x27   : > { %p557_p9 = pnand %p556_p7, %p552_p3 }
  0x28   : > { %302 = vmatpush.msra.mxu1 %v287_v11 }
  0x2a   : > { %303 = vmatpush.msra.mxu1 %v286_v12 }
  0x2c   : > { %304 = vmatpush.msra.mxu1 %v285_v13 }
  0x2e   : > { %305 = vmatpush.msra.mxu1 %v284_v14 }
  0x30   : > { %306 = vmatpush.msra.mxu1 %v283_v15 }
  0x32   : > { %307 = vmatpush.msra.mxu1 %v282_v16 }
  0x34   : > { %308 = vmatpush.msra.mxu1 %v281_v17 }
  0x36   : > { %309 = vmatpush.msra.mxu1 %v280_v18 }
  0x38   : > { %310 = vmatpush.msra.mxu1 %v279_v19 }
  0x8d   : > { %v249_v20 = vpop.permute.xlu0 %248 }
  0x9d   : > { %v276_v21 = vpop.f32.mrf.mxu0 }
  0x9e   : > { %v277_v22 = vadd.f32 %v276_v21, %v249_v20 }
  0xa0   : > { %311 = vmatmul.f32.vlgmr.msra.gmra.mxu1 %v277_v22 }
 0x11d   : > { %v312_v23 = vpop.f32.mrf.mxu1 }
 0x11e   : > { %315 = vst [vmem:[%s235_s9] sm:$0xff] %v312_v23 }
 0x11f   : > { %560 = shalt.err (!%p557_p9)
}
 0x120   : > { %437 = dma.vmem_to_hbm [thread:$0]  (%p686_p4), %s331_s10, 128, %s333_s11, %s317_s12  }
 0x121 PF: > { %p449_p10 = scmp.ge.s32.totalorder %s615_s20, 2  ;;  %s344_s29 = sand.u32 1, %s595_s15  }
 0x122   : > { %s345_s30 = scalar_lea.sflag [#allocation4], %s344_s29 }
 0x123   : > { %p444_p11 = pnand %p449_p10, %p693_p8 }
 0x125   : > { %p445_p12 = pneg %p444_p11 }
 0x127   : > { %590 = dma.done.wait (%p445_p12), %s345_s30, 128  }
 0x128   : > { %592 = vsyncadd (%p445_p12), %s345_s30, 4294967168  ;;  %s18_s20 = sadd.s32 1, %s615_s20   ;;  %s759_s15 = smov %s599_s16 }
 0x129   : > { %p15_p13 = scmp.ge.s32.totalorder %s18_s20, 4   ;;  %s760_s16 = smov %s603_s17 }
 0x12a   : > { %s761_s17 = smov %s699_s28  ;;  %s762_s18 = smov %s611_s19 }
 0x12b   : > { %s763_s19 = smov %s765_s23  ;;  %17 = sbr.rel (!%p15_p13) target bundleno = 5 (0x5), region = 77 }
 0x130   :  { %351 = vsyncpa [#allocation3], 1 }
 0x131   :  { %353 = vsyncpa [#allocation3 + $0x1], 1 }
 0x132   :  { %354 = vsyncpa [#allocation4], 1 }
 0x133   :  { %356 = vsyncpa [#allocation4 + $0x1], 1 }

</bundles_post_ra>
